<compile_context>
chip_gen: v5e
topology: v5e:2x2
jax: 0.10.0
libtpu: 0.0.40
codegen_flags: <defaults>
</compile_context>

<pallas_src>
import numpy as np

import jax
import jax.numpy as jnp
from jax import lax
from jax.experimental import pallas as pl
from jax.experimental.pallas import tpu as pltpu


# ---------------------------------------------------------------------------
# Static sub-pixel plan
# ---------------------------------------------------------------------------
def _subpixel_plan(k, stride, padding):
    """For each output phase (ry, rx) list the taps (ky, kx, uy, ux).

    y[co, s*qy+ry, s*qx+rx] += x[ci, qy+uy, qx+ux] * W[ci, co, ky, kx]
    (out-of-range input indices contribute zero).
    """
    s, p = stride, padding
    phases = []
    for ry in range(s):
        kys = list(range((ry + p) % s, k, s))
        dy = (ry + p) // s
        for rx in range(s):
            kxs = list(range((rx + p) % s, k, s))
            dx = (rx + p) // s
            taps = []
            for ty, ky in enumerate(kys):
                for tx, kx in enumerate(kxs):
                    taps.append((ky, kx, dy - ty, dx - tx))
            phases.append(taps)
    return phases


# ---------------------------------------------------------------------------
# Kernel factory (all metadata is static / baked into the closure)
# ---------------------------------------------------------------------------
def _make_kernel(cin_p, cout, h, w, phases, shift_list, phase_sidx, mxu_dtype):
    hw = h * w
    # Per-phase column offsets into the packed weight matrix.
    kofs, off = [], 0
    for taps in phases:
        kofs.append(off)
        off += len(taps) * cin_p

    def kernel(x_ref, w_ref, m_ref, b_ref, a_ref, o_ref):
        f32 = jnp.float32
        x = x_ref[0]                                   # [Cin_p, H*W]  f32
        b = b_ref[...]                                 # [Cout, 1]     f32
        a = a_ref[...]                                 # [1|Cout, 1]   f32

        # Distinct shifted+masked taps of the (un-dilated) input, built once
        # and shared by all phases.  Shifts go to the XLU via pltpu.roll.
        taps = []
        for si, (uy, ux) in enumerate(shift_list):
            delta = uy * w + ux                        # flat (lane) shift
            t = x if delta == 0 else pltpu.roll(x, shift=(-delta) % hw, axis=1)
            if not (uy == 0 and ux == 0):              # boundary zero-fill
                t = t * m_ref[si:si + 1, :]
            taps.append(t)

        for ph, tap_list in enumerate(phases):
            kph = len(tap_list) * cin_p
            if kph == 0:                               # degenerate phase (k < s)
                y = jnp.broadcast_to(b, (cout, hw))
            else:
                blocks = [taps[sidx] for sidx in phase_sidx[ph]]
                p_blk = blocks[0] if len(blocks) == 1 else jnp.concatenate(blocks, axis=0)
                wph = w_ref[:, kofs[ph]:kofs[ph] + kph]                # [Cout, kph] bf16
                y = jnp.dot(wph, p_blk.astype(mxu_dtype),
                            preferred_element_type=f32)                # [Cout, HW]  f32
                y = y + b
            y = jnp.where(y >= 0.0, y, a * y)          # PReLU (scalar or per-channel)
            o_ref[0, ph] = y.astype(o_ref.dtype)       # lane-dense, unmasked store

    return kernel


# ---------------------------------------------------------------------------
# Wrapper
# ---------------------------------------------------------------------------
def prelu_deconv_forward(x, weight, bias, prelu_weight, *,
                         stride=1, padding=0, output_padding=0,
                         mxu_dtype=jnp.bfloat16, out_dtype=jnp.float32):
    """Forward of PreluDeconv.  x: [N, Cin, H, W] NCHW.  Returns NCHW f32."""
    n, cin, h, w = x.shape
    cin_w, cout, kh, kw = weight.shape                # ConvTranspose2d layout
    assert cin_w == cin and kh == kw
    k, s, p, op = kh, stride, padding, output_padding

    hout = (h - 1) * s - 2 * p + k + op
    wout = (w - 1) * s - 2 * p + k + op
    # Supported configs: output is an exact s-times upsampling of the input,
    # i.e. k + output_padding == stride + 2*padding (covers k3/s2/p1/op1,
    # k4/s2/p1, k2/s2/p0 and any stride-1 "same" deconv with k = 2p+1).
    assert hout == s * h and wout == s * w, (
        "prelu_deconv_forward: only k + output_padding == stride + 2*padding "
        "configurations are supported")
    # TODO(synk): general output geometries (hout != s*h), groups > 1 and
    # dilation > 1 of ConvTranspose2d are not implemented.

    hw = h * w
    cin_p = -(-cin // 8) * 8                          # pad channels to sublane multiple

    phases = _subpixel_plan(k, s, p)

    # ---- distinct shifts + static boundary masks (hoisted out of the kernel)
    shift_to_idx, shift_list, phase_sidx = {}, [], []
    for taps in phases:
        sidx = []
        for (_, _, uy, ux) in taps:
            if (uy, ux) not in shift_to_idx:
                shift_to_idx[(uy, ux)] = len(shift_list)
                shift_list.append((uy, ux))
            sidx.append(shift_to_idx[(uy, ux)])
        phase_sidx.append(sidx)

    masks = np.zeros((len(shift_list), hw), np.float32)
    for si, (uy, ux) in enumerate(shift_list):
        iy = np.arange(h)[:, None] + uy
        ix = np.arange(w)[None, :] + ux
        valid = (iy >= 0) & (iy < h) & (ix >= 0) & (ix < w)
        masks[si] = valid.astype(np.float32).reshape(-1)
    masks = jnp.asarray(masks)                                        # [nshift, HW]

    # ---- pack ConvTranspose2d weights phase-major: [Cout, sum_ph Tph*Cin_p]
    wf = weight.astype(jnp.float32)
    blocks = []
    for taps in phases:
        for (ky, kx, _, _) in taps:
            blk = wf[:, :, ky, kx].T                                  # [Cout, Cin]
            if cin_p != cin:
                blk = jnp.pad(blk, ((0, 0), (0, cin_p - cin)))
            blocks.append(blk)
    w_packed = jnp.concatenate(blocks, axis=1).astype(mxu_dtype)      # [Cout, K]

    b_col = bias.reshape(cout, 1).astype(jnp.float32)                 # [Cout, 1]
    a_col = jnp.reshape(prelu_weight, (-1, 1)).astype(jnp.float32)    # [1|Cout, 1]

    # ---- activations: channel-padded, spatially flattened (lane-dense)
    x_flat = x.reshape(n, cin, hw).astype(jnp.float32)
    if cin_p != cin:
        x_flat = jnp.pad(x_flat, ((0, 0), (0, cin_p - cin), (0, 0)))

    kk = w_packed.shape[1]
    nshift = masks.shape[0]
    na = a_col.shape[0]

    kernel = _make_kernel(cin_p, cout, h, w, phases, shift_list, phase_sidx, mxu_dtype)

    out_phases = pl.pallas_call(
        kernel,
        out_shape=jax.ShapeDtypeStruct((n, s * s, cout, hw), out_dtype),
        grid=(n,),
        in_specs=[
            pl.BlockSpec((1, cin_p, hw), lambda i: (i, 0, 0)),        # activation
            pl.BlockSpec((cout, kk), lambda i: (0, 0)),               # packed weights
            pl.BlockSpec((nshift, hw), lambda i: (0, 0)),             # boundary masks
            pl.BlockSpec((cout, 1), lambda i: (0, 0)),                # bias
            pl.BlockSpec((na, 1), lambda i: (0, 0)),                  # PReLU slope(s)
        ],
        out_specs=pl.BlockSpec((1, s * s, cout, hw), lambda i: (i, 0, 0, 0)),
        compiler_params=pltpu.CompilerParams(
            dimension_semantics=("parallel",)),       # batch axis -> both TCs on v7x
    )(x_flat, w_packed, masks, b_col, a_col)

    # Pixel-shuffle the per-phase lane-dense slabs back to NCHW.  The only
    # wrapper-side cost is one small transpose of the output; all in-kernel
    # stores stay unmasked and lane-dense.
    y = out_phases.reshape(n, s, s, cout, h, w)       # [N, ry, rx, Cout, qy, qx]
    y = jnp.transpose(y, (0, 3, 4, 1, 5, 2))          # [N, Cout, qy, ry, qx, rx]
    return y.reshape(n, cout, hout, wout)


# ---------------------------------------------------------------------------
# Pure-JAX reference (PyTorch ConvTranspose2d -> PReLU), same bf16 MXU inputs.
# ---------------------------------------------------------------------------
def prelu_deconv_reference(x, weight, bias, prelu_weight, *,
                           stride=1, padding=0, output_padding=0,
                           mxu_dtype=jnp.bfloat16):
    k = weight.shape[2]
    pp = k - 1 - padding
    w_conv = jnp.transpose(jnp.flip(weight, axis=(2, 3)), (1, 0, 2, 3))   # OIHW
    y = lax.conv_general_dilated(
        x.astype(mxu_dtype), w_conv.astype(mxu_dtype),
        window_strides=(1, 1),
        padding=[(pp, pp + output_padding), (pp, pp + output_padding)],
        lhs_dilation=(stride, stride),
        dimension_numbers=("NCHW", "OIHW", "NCHW"),
        preferred_element_type=jnp.float32)
    y = y + bias.reshape(1, -1, 1, 1).astype(jnp.float32)
    a = jnp.reshape(prelu_weight, (1, -1, 1, 1)).astype(jnp.float32)
    return jnp.where(y >= 0.0, y, a * y)


if __name__ == "__main__":
    key = jax.random.PRNGKey(0)
    # PreluDeconv(in_channels=4, out_channels=8, kernel_size=3,
    #             padding=1, output_padding=1, stride=2)  -> 2x upsampling
    N, CIN, COUT = 2, 4, 8
    H, W = 16, 16
    KSIZE, STRIDE, PAD, OUT_PAD = 3, 2, 1, 1

    k_x, k_w, k_b = jax.random.split(key, 3)
    x = jax.random.normal(k_x, (N, CIN, H, W), jnp.float32)
    # ConvTranspose2d weight layout: [in_channels, out_channels, kH, kW]
    fan_in = CIN * KSIZE * KSIZE
    weight = jax.random.normal(k_w, (CIN, COUT, KSIZE, KSIZE), jnp.float32) / jnp.sqrt(fan_in)
    bias = 0.1 * jax.random.normal(k_b, (COUT,), jnp.float32)
    prelu_weight = jnp.full((1,), 0.25, jnp.float32)   # nn.PReLU() default init
    # (prelu_weight of shape (COUT,) — nn.PReLU(num_parameters=C) — also works.)

    out = prelu_deconv_forward(x, weight, bias, prelu_weight,
                               stride=STRIDE, padding=PAD, output_padding=OUT_PAD)
    out = jax.block_until_ready(out)

    ref = prelu_deconv_reference(x, weight, bias, prelu_weight,
                                 stride=STRIDE, padding=PAD, output_padding=OUT_PAD)
    assert out.shape == ref.shape == (N, COUT, 2 * H, 2 * W), out.shape
    max_err = jnp.max(jnp.abs(out - ref))
    assert jnp.allclose(out, ref, rtol=2e-3, atol=2e-3), f"max abs err = {max_err}"

    print("KERNEL_OK")
</pallas_src>

<mosaic_0001>
module attributes {stable_mosaic.version = 11 : i64} {
  func.func @kernel(%arg0: i32, %arg1: memref<1x8x256xf32, #tpu.memory_space<vmem>>, %arg2: memref<8x72xbf16, #tpu.memory_space<vmem>>, %arg3: memref<4x256xf32, #tpu.memory_space<vmem>>, %arg4: memref<8x1xf32, #tpu.memory_space<vmem>>, %arg5: memref<1x1xf32, #tpu.memory_space<vmem>>, %arg6: memref<1x4x8x256xf32, #tpu.memory_space<vmem>>) attributes {dimension_semantics = [#tpu.dimension_semantics<parallel>], iteration_bounds = array<i64: 2>, scalar_prefetch = 0 : i64, scratch_operands = 0 : i64, tpu.core_type = #tpu.core_type<tc>, window_params = [{transform_indices = @transform_0, window_bounds = array<i64: 1, 8, 256>}, {pipeline_mode = #tpu.pipeline_mode<synchronous>, transform_indices = @transform_1, window_bounds = array<i64: 8, 72>}, {pipeline_mode = #tpu.pipeline_mode<synchronous>, transform_indices = @transform_2, window_bounds = array<i64: 4, 256>}, {pipeline_mode = #tpu.pipeline_mode<synchronous>, transform_indices = @transform_3, window_bounds = array<i64: 8, 1>}, {pipeline_mode = #tpu.pipeline_mode<synchronous>, transform_indices = @transform_4, window_bounds = array<i64: 1, 1>}, {transform_indices = @transform_5, window_bounds = array<i64: 1, 4, 8, 256>}]} {
    %c0 = arith.constant 0 : index
    %c0_0 = arith.constant 0 : index
    %c0_1 = arith.constant 0 : index
    %0 = vector.load %arg1[%c0, %c0_0, %c0_1] : memref<1x8x256xf32, #tpu.memory_space<vmem>>, vector<1x8x256xf32>
    %1 = vector.shape_cast %0 : vector<1x8x256xf32> to vector<8x256xf32>
    %c0_2 = arith.constant 0 : index
    %c0_3 = arith.constant 0 : index
    %2 = vector.load %arg4[%c0_2, %c0_3] : memref<8x1xf32, #tpu.memory_space<vmem>>, vector<8x1xf32>
    %c0_4 = arith.constant 0 : index
    %c0_5 = arith.constant 0 : index
    %3 = vector.load %arg5[%c0_4, %c0_5] : memref<1x1xf32, #tpu.memory_space<vmem>>, vector<1x1xf32>
    %c255_i32 = arith.constant 255 : i32
    %4 = tpu.dynamic_rotate %1 by %c255_i32 dim 1 : vector<8x256xf32>, i32 -> vector<8x256xf32>
    %c1 = arith.constant 1 : index
    %c0_6 = arith.constant 0 : index
    %5 = vector.load %arg3[%c1, %c0_6] : memref<4x256xf32, #tpu.memory_space<vmem>>, vector<1x256xf32>
    %6 = vector.broadcast %5 : vector<1x256xf32> to vector<8x256xf32>
    %7 = arith.mulf %4, %6 : vector<8x256xf32>
    %c240_i32 = arith.constant 240 : i32
    %8 = tpu.dynamic_rotate %1 by %c240_i32 dim 1 : vector<8x256xf32>, i32 -> vector<8x256xf32>
    %c2 = arith.constant 2 : index
    %c0_7 = arith.constant 0 : index
    %9 = vector.load %arg3[%c2, %c0_7] : memref<4x256xf32, #tpu.memory_space<vmem>>, vector<1x256xf32>
    %10 = vector.broadcast %9 : vector<1x256xf32> to vector<8x256xf32>
    %11 = arith.mulf %8, %10 : vector<8x256xf32>
    %c239_i32 = arith.constant 239 : i32
    %12 = tpu.dynamic_rotate %1 by %c239_i32 dim 1 : vector<8x256xf32>, i32 -> vector<8x256xf32>
    %c3 = arith.constant 3 : index
    %c0_8 = arith.constant 0 : index
    %13 = vector.load %arg3[%c3, %c0_8] : memref<4x256xf32, #tpu.memory_space<vmem>>, vector<1x256xf32>
    %14 = vector.broadcast %13 : vector<1x256xf32> to vector<8x256xf32>
    %15 = arith.mulf %12, %14 : vector<8x256xf32>
    %c0_9 = arith.constant 0 : index
    %c0_10 = arith.constant 0 : index
    %16 = vector.load %arg2[%c0_9, %c0_10] : memref<8x72xbf16, #tpu.memory_space<vmem>>, vector<8x8xbf16>
    %17 = arith.truncf %1 : vector<8x256xf32> to vector<8x256xbf16>
    %cst = arith.constant dense<0.000000e+00> : vector<8x256xf32>
    %18 = tpu.matmul %16, %17, %cst {dimension_numbers = #tpu.dot_dimension_numbers<[1], [0], [0], [1], [0, 0, 1, 1], [], []>} : vector<8x8xbf16>, vector<8x256xbf16>, vector<8x256xf32> -> vector<8x256xf32>
    %19 = vector.broadcast %2 : vector<8x1xf32> to vector<8x256xf32>
    %20 = arith.addf %18, %19 : vector<8x256xf32>
    %cst_11 = arith.constant 0.000000e+00 : f32
    %21 = vector.broadcast %cst_11 : f32 to vector<8x256xf32>
    %22 = arith.cmpf oge, %20, %21 : vector<8x256xf32>
    %23 = vector.broadcast %3 : vector<1x1xf32> to vector<8x256xf32>
    %24 = arith.mulf %23, %20 : vector<8x256xf32>
    %25 = arith.select %22, %20, %24 : vector<8x256xi1>, vector<8x256xf32>
    %c0_12 = arith.constant 0 : index
    %c0_13 = arith.constant 0 : index
    %c0_14 = arith.constant 0 : index
    %c0_15 = arith.constant 0 : index
    %26 = vector.load %arg6[%c0_12, %c0_13, %c0_14, %c0_15] : memref<1x4x8x256xf32, #tpu.memory_space<vmem>>, vector<1x1x8x256xf32>
    %27 = vector.shape_cast %26 : vector<1x1x8x256xf32> to vector<8x256xf32>
    %28 = vector.shape_cast %25 : vector<8x256xf32> to vector<1x1x8x256xf32>
    tpu.vector_store %arg6[%c0_12, %c0_13, %c0_14, %c0_15], %28 {strides = array<i32>} : memref<1x4x8x256xf32, #tpu.memory_space<vmem>>, vector<1x1x8x256xf32>,
    %29 = tpu.concatenate %7, %1 in 0 : vector<8x256xf32>, vector<8x256xf32> -> vector<16x256xf32>
    %c0_16 = arith.constant 0 : index
    %c8 = arith.constant 8 : index
    %30 = vector.load %arg2[%c0_16, %c8] : memref<8x72xbf16, #tpu.memory_space<vmem>>, vector<8x16xbf16>
    %31 = arith.truncf %29 : vector<16x256xf32> to vector<16x256xbf16>
    %cst_17 = arith.constant dense<0.000000e+00> : vector<8x256xf32>
    %32 = tpu.matmul %30, %31, %cst_17 {dimension_numbers = #tpu.dot_dimension_numbers<[1], [0], [0], [1], [0, 0, 1, 1], [], []>} : vector<8x16xbf16>, vector<16x256xbf16>, vector<8x256xf32> -> vector<8x256xf32>
    %33 = vector.broadcast %2 : vector<8x1xf32> to vector<8x256xf32>
    %34 = arith.addf %32, %33 : vector<8x256xf32>
    %cst_18 = arith.constant 0.000000e+00 : f32
    %35 = vector.broadcast %cst_18 : f32 to vector<8x256xf32>
    %36 = arith.cmpf oge, %34, %35 : vector<8x256xf32>
    %37 = vector.broadcast %3 : vector<1x1xf32> to vector<8x256xf32>
    %38 = arith.mulf %37, %34 : vector<8x256xf32>
    %39 = arith.select %36, %34, %38 : vector<8x256xi1>, vector<8x256xf32>
    %c0_19 = arith.constant 0 : index
    %c1_20 = arith.constant 1 : index
    %c0_21 = arith.constant 0 : index
    %c0_22 = arith.constant 0 : index
    %40 = vector.load %arg6[%c0_19, %c1_20, %c0_21, %c0_22] : memref<1x4x8x256xf32, #tpu.memory_space<vmem>>, vector<1x1x8x256xf32>
    %41 = vector.shape_cast %40 : vector<1x1x8x256xf32> to vector<8x256xf32>
    %42 = vector.shape_cast %39 : vector<8x256xf32> to vector<1x1x8x256xf32>
    tpu.vector_store %arg6[%c0_19, %c1_20, %c0_21, %c0_22], %42 {strides = array<i32>} : memref<1x4x8x256xf32, #tpu.memory_space<vmem>>, vector<1x1x8x256xf32>,
    %43 = tpu.concatenate %11, %1 in 0 : vector<8x256xf32>, vector<8x256xf32> -> vector<16x256xf32>
    %c0_23 = arith.constant 0 : index
    %c24 = arith.constant 24 : index
    %44 = vector.load %arg2[%c0_23, %c24] : memref<8x72xbf16, #tpu.memory_space<vmem>>, vector<8x16xbf16>
    %45 = arith.truncf %43 : vector<16x256xf32> to vector<16x256xbf16>
    %cst_24 = arith.constant dense<0.000000e+00> : vector<8x256xf32>
    %46 = tpu.matmul %44, %45, %cst_24 {dimension_numbers = #tpu.dot_dimension_numbers<[1], [0], [0], [1], [0, 0, 1, 1], [], []>} : vector<8x16xbf16>, vector<16x256xbf16>, vector<8x256xf32> -> vector<8x256xf32>
    %47 = vector.broadcast %2 : vector<8x1xf32> to vector<8x256xf32>
    %48 = arith.addf %46, %47 : vector<8x256xf32>
    %cst_25 = arith.constant 0.000000e+00 : f32
    %49 = vector.broadcast %cst_25 : f32 to vector<8x256xf32>
    %50 = arith.cmpf oge, %48, %49 : vector<8x256xf32>
    %51 = vector.broadcast %3 : vector<1x1xf32> to vector<8x256xf32>
    %52 = arith.mulf %51, %48 : vector<8x256xf32>
    %53 = arith.select %50, %48, %52 : vector<8x256xi1>, vector<8x256xf32>
    %c0_26 = arith.constant 0 : index
    %c2_27 = arith.constant 2 : index
    %c0_28 = arith.constant 0 : index
    %c0_29 = arith.constant 0 : index
    %54 = vector.load %arg6[%c0_26, %c2_27, %c0_28, %c0_29] : memref<1x4x8x256xf32, #tpu.memory_space<vmem>>, vector<1x1x8x256xf32>
    %55 = vector.shape_cast %54 : vector<1x1x8x256xf32> to vector<8x256xf32>
    %56 = vector.shape_cast %53 : vector<8x256xf32> to vector<1x1x8x256xf32>
    tpu.vector_store %arg6[%c0_26, %c2_27, %c0_28, %c0_29], %56 {strides = array<i32>} : memref<1x4x8x256xf32, #tpu.memory_space<vmem>>, vector<1x1x8x256xf32>,
    %57 = tpu.concatenate %15, %11, %7, %1 in 0 : vector<8x256xf32>, vector<8x256xf32>, vector<8x256xf32>, vector<8x256xf32> -> vector<32x256xf32>
    %c0_30 = arith.constant 0 : index
    %c40 = arith.constant 40 : index
    %58 = vector.load %arg2[%c0_30, %c40] : memref<8x72xbf16, #tpu.memory_space<vmem>>, vector<8x32xbf16>
    %59 = arith.truncf %57 : vector<32x256xf32> to vector<32x256xbf16>
    %cst_31 = arith.constant dense<0.000000e+00> : vector<8x256xf32>
    %60 = tpu.matmul %58, %59, %cst_31 {dimension_numbers = #tpu.dot_dimension_numbers<[1], [0], [0], [1], [0, 0, 1, 1], [], []>} : vector<8x32xbf16>, vector<32x256xbf16>, vector<8x256xf32> -> vector<8x256xf32>
    %61 = vector.broadcast %2 : vector<8x1xf32> to vector<8x256xf32>
    %62 = arith.addf %60, %61 : vector<8x256xf32>
    %cst_32 = arith.constant 0.000000e+00 : f32
    %63 = vector.broadcast %cst_32 : f32 to vector<8x256xf32>
    %64 = arith.cmpf oge, %62, %63 : vector<8x256xf32>
    %65 = vector.broadcast %3 : vector<1x1xf32> to vector<8x256xf32>
    %66 = arith.mulf %65, %62 : vector<8x256xf32>
    %67 = arith.select %64, %62, %66 : vector<8x256xi1>, vector<8x256xf32>
    %c0_33 = arith.constant 0 : index
    %c3_34 = arith.constant 3 : index
    %c0_35 = arith.constant 0 : index
    %c0_36 = arith.constant 0 : index
    %68 = vector.load %arg6[%c0_33, %c3_34, %c0_35, %c0_36] : memref<1x4x8x256xf32, #tpu.memory_space<vmem>>, vector<1x1x8x256xf32>
    %69 = vector.shape_cast %68 : vector<1x1x8x256xf32> to vector<8x256xf32>
    %70 = vector.shape_cast %67 : vector<8x256xf32> to vector<1x1x8x256xf32>
    tpu.vector_store %arg6[%c0_33, %c3_34, %c0_35, %c0_36], %70 {strides = array<i32>} : memref<1x4x8x256xf32, #tpu.memory_space<vmem>>, vector<1x1x8x256xf32>,
    return
  }
  func.func @transform_0(%arg0: i32) -> (i32, i32, i32) {
    %c0_i32 = arith.constant 0 : i32
    %c0_i32_0 = arith.constant 0 : i32
    %c0_i32_1 = arith.constant 0 : i32
    return %arg0, %c0_i32, %c0_i32_0 : i32, i32, i32
  }
  func.func @transform_1(%arg0: i32) -> (i32, i32) {
    %c0_i32 = arith.constant 0 : i32
    %c0_i32_0 = arith.constant 0 : i32
    %c0_i32_1 = arith.constant 0 : i32
    return %c0_i32, %c0_i32_0 : i32, i32
  }
  func.func @transform_2(%arg0: i32) -> (i32, i32) {
    %c0_i32 = arith.constant 0 : i32
    %c0_i32_0 = arith.constant 0 : i32
    %c0_i32_1 = arith.constant 0 : i32
    return %c0_i32, %c0_i32_0 : i32, i32
  }
  func.func @transform_3(%arg0: i32) -> (i32, i32) {
    %c0_i32 = arith.constant 0 : i32
    %c0_i32_0 = arith.constant 0 : i32
    %c0_i32_1 = arith.constant 0 : i32
    return %c0_i32, %c0_i32_0 : i32, i32
  }
  func.func @transform_4(%arg0: i32) -> (i32, i32) {
    %c0_i32 = arith.constant 0 : i32
    %c0_i32_0 = arith.constant 0 : i32
    %c0_i32_1 = arith.constant 0 : i32
    return %c0_i32, %c0_i32_0 : i32, i32
  }
  func.func @transform_5(%arg0: i32) -> (i32, i32, i32, i32) {
    %c0_i32 = arith.constant 0 : i32
    %c0_i32_0 = arith.constant 0 : i32
    %c0_i32_1 = arith.constant 0 : i32
    %c0_i32_2 = arith.constant 0 : i32
    return %arg0, %c0_i32, %c0_i32_0, %c0_i32_1 : i32, i32, i32, i32
  }
}

</mosaic_0001>

<bundles_post_ra>
// kernel: tpu_custom_call.1
= control target key start
LH: loop header
LB: loop body
LE: loop exit
PB: predicated region body
PF: predicated region fallthrough
CT: control target
= control target key end

     0   :  { %s1076_s0 = inlined_call_operand.hbm [shape: f32[2,8,256], index: 0, kind: input, shape index: {}]   ;;  %s1077_s1 = inlined_call_operand.hbm [shape: bf16[8,72], index: 1, kind: input, shape index: {}]   ;;  %s1078_s2 = inlined_call_operand.vmem [shape: f32[4,256], index: 2, kind: input, shape index: {}]   ;;  %s1079_s3 = inlined_call_operand.vmem [shape: f32[8,1], index: 3, kind: input, shape index: {}]   ;;  %s1080_s4 = inlined_call_operand.<no memory space> [shape: f32[1,1], index: 4, kind: input, shape index: {}]   ;;  %s1081_s5 = inlined_call_operand.hbm [shape: f32[2,4,8,256], index: 5, kind: output, shape index: {}]  }
   0x1   :  { %v10_v0 = vstv %s1080_s4 }
   0x2   :  { %11 = vst [vmem:[#allocation2] sm:$0x1] %v10_v0 }
   0x3   :  { %12 = vsyncpa [#allocation4], 0 }
   0x4   :  { %14 = vsyncpa [#allocation4 + $0x1], 0 }
   0x5   :  { %15 = vsyncpa [#allocation7], 0 }
   0x6   :  { %16 = vsyncpa [#allocation5], 0 }
   0x7   :  { %18 = vsyncpa [#allocation5 + $0x1], 0  ;;  %s892_s20 = smov 0   ;;  %s894_s21 = smov 0  }
   0x8   :  { %s896_s22 = smov 0   ;;  %s898_s23 = smov 0  }
   0x9 LB: > { %s913_s4 = sadd.s32 4294967295, %s847_s23   ;;  %s613_s24 = sadd.s32 4294967294, %s847_s23   ;;  %s847_s23 = sphi %s898_s23, %s1091_s23   ;;  %s843_s22 = sphi %s896_s22, %s1090_s22   ;;  %s839_s21 = sphi %s894_s21, %s1089_s21   ;;  %s835_s20 = sphi %s892_s20, %s1088_s20  }
   0xa   : > { %p44_p0 = scmp.ne.s32.totalorder %s839_s21, %s835_s20  ;;  %p45_p1 = scmp.eq.s32.totalorder %s913_s4, 0 }
   0xb   : > { %p152_p2 = scmp.eq.s32.totalorder %s913_s4, 1  ;;  %p158_p3 = scmp.eq.s32.totalorder %s613_s24, 1 }
   0xc   : > { %p922_p4 = por %p45_p1, %p44_p0  ;;  %p614_p5 = scmp.ge.s32.totalorder %s847_s23, 1 }
   0xd   : > { %p927_p6 = por %p158_p3, %p44_p0  ;;  %p165_p7 = scmp.lt.s32.totalorder %s847_s23, 3 }
   0xe   : > { %s177_s29 = sshll.u32 %s1077_s1, 4  ;;  %s849_s6 = smov [#allocation6]   ;;  %s178_s29 = int_to_ptr.hbm [resolvable:$true] %s177_s29 }
   0xf   : > { %p935_p8 = pnand %p614_p5, %p165_p7  ;;  %s179_s7 = sshll.u32 %s849_s6, 4  ;;  %s180_s7 = int_to_ptr.vmem [resolvable:$true] %s179_s7 }
  0x10   : > { %s945_s8 = sadd.s32 1, %s847_s23   ;;  %s31_s9 = sadd.s32 1, %s843_s22 }
  0x11   : > { %p656_p10 = pneg %p935_p8  ;;  %s28_s10 = ssub.s32 %s847_s23, %s945_s8 }
  0x12   : > { %p29_p12 = scmp.eq.s32.totalorder %s28_s10, 0  ;;  %p38_p13 = scmp.ne.s32.totalorder %s843_s22, %s839_s21 }
  0x13   : > { %p657_p11 = pnand %p656_p10, %p45_p1  ;;  %p39_p0 = scmp.eq.s32.totalorder %s847_s23, 0 }
  0x14   : > { %s954_s11 = scalar_select %p29_p12, %s843_s22, %s31_s9  }
  0x15   : > { %659 = dma.hbm_to_vmem [thread:$0]  (!%p657_p11), %s178_s29, 64, %s180_s7, [#allocation7]  }
  0x16   : > { %p958_p3 = por %p152_p2, %p38_p13  ;;  %p669_p5 = scmp.lt.s32.totalorder %s847_s23, 2 }
  0x17   : > { %s199_s13 = sand.u32 1, %s843_s22   ;;  %s646_s14 = sshll.u32 %s847_s23, 4 }
  0x18   : > { %p40_p7 = por %p39_p0, %p38_p13  ;;  %s617_s15 = sshll.u32 %s199_s13, 4 }
  0x19   : > { %s208_s18 = scalar_lea.hbm %s1076_s0, %s646_s14  ;;  %s203_s24 = scalar_lea.vmem [#allocation3], %s617_s15 }
  0x1a   : > { %s210_s19 = sshll.u32 %s208_s18, 4  ;;  %s212_s27 = sshll.u32 %s203_s24, 4  ;;  %s211_s19 = int_to_ptr.hbm [resolvable:$true] %s210_s19  ;;  %s213_s27 = int_to_ptr.vmem [resolvable:$true] %s212_s27 }
  0x1b   : > { %p968_p10 = pnand %p669_p5, %p40_p7  ;;  %s200_s29 = scalar_lea.sflag [#allocation4], %s199_s13 }
  0x1c   : > { %s747_s6 = sshra.s32 %s211_s19, 4  ;;  %s754_s14 = scalar_lea.hbm %s1076_s0, 32  ;;  %s748_s6 = int_to_ptr.hbm [resolvable:$true] %s747_s6 }
  0x1d   : > { %s749_s7 = scalar_lea.hbm %s748_s6, 16  ;;  %p751_p11 = pneg %p968_p10 }
  0x1e   : > { %p750_p2 = scmp.ne.s32.totalorder %s748_s6, %s749_s7  ;;  %p755_p0 = scmp.lt.s32.totalorder %s748_s6, %s1076_s0 }
  0x1f   : > { %p756_p5 = scmp.lt.s32.totalorder %s754_s14, %s749_s7 }
  0x20   : > { %p752_p12 = pnand %p751_p11, %p750_p2 }
  0x21   : > { %p757_p7 = por %p756_p5, %p755_p0 }
  0x22   : > { %p753_p13 = pneg %p752_p12 }
  0x24   : > { %p758_p9 = pnand %p757_p7, %p753_p13 }
  0x26   : > { %761 = shalt.err (!%p758_p9)
}
  0x27   : > { %663 = dma.hbm_to_vmem [thread:$0]  (!%p968_p10), %s211_s19, 256, %s213_s27, %s200_s29  }
  0x28   : > { %221 = sbr.rel (%p935_p8) target bundleno = 341 (0x155), region = 40  ;;  %s985_s13 = sand.u32 (!%p935_p8), 1, %s839_s21  }
  0x29   : > { %s621_s17 = sshll.u32 (!%p935_p8), %s985_s13, 4  ;;  %s224_s18 = scalar_lea.sflag (!%p935_p8), [#allocation4], %s985_s13 }
  0x2a   : > { %s227_s24 = scalar_lea.vmem (!%p935_p8), [#allocation3], %s621_s17 }
  0x2d   : > { %822 = dma.done.wait (%p922_p4), %s224_s18, 256  }
  0x2e   : > { %824 = vsyncadd (%p922_p4), %s224_s18, 4294967040 }
  0x2f   : > { %826 = dma.done.wait (%p45_p1), [#allocation7], 64  }
  0x30   : > { %828 = vsyncadd (%p45_p1), [#allocation7], 4294967232  ;;  %v997_v1 = vld [vmem:[%s227_s24] sm:$0xff]  ;;  %v999_v3 = vld [vmem:[%s227_s24 + $0x8] sm:$0xff]  ;;  %s850_s30 = smov 127   ;;  %s851_s19 = smov 112   ;;  %v269_v19 = vlaneseq }
  0x31   : > { %v374_v2 = vld [vmem:[#allocation6] sm:$0xf]  ;;  %265 = vrot.lane.b32.xlu0 %v997_v1, %s850_s30  ;;  %285 = vrot.lane.b32.xlu2 %v999_v3, %s851_s19  ;;  %s852_s25 = smov 120   ;;  %s853_s27 = smov 111   ;;  %v317_v12 = vpack.c.bf16 %v999_v3, %v999_v3  ;;  %v316_v13 = vpack.c.bf16 %v997_v1, %v997_v1  ;;  %vm327_vm0 = vcmask 1043456   ;;  %vm323_vm1 = vcmask 64512  }
  0x32   : > { %v378_v4 = vunpack.c.l.b16 %v374_v2  ;;  %v421_v6 = vld [vmem:[#allocation6] sm:$0xf]  ;;  %s854_s28 = smov 104   ;;  %s855_s29 = smov 88   ;;  %v856_v18 = vmov 0   ;;  %v270_v23 = vand.u32 127, %v269_v19 }
  0x33   : > { %v425_v7 = vunpack.c.l.b16 %v421_v6  ;;  %v467_v8 = vld [vmem:[#allocation6] sm:$0xf]  ;;  %v332_v14 = vsel %vm327_vm0, %v317_v12, 0  ;;  %v329_v15 = vsel %vm327_vm0, %v316_v13, 0  ;;  %714 = vset.pattern.permute.xlu0 %v856_v18  ;;  %715 = vset.pattern.permute.xlu1 %v856_v18  ;;  %v716_v22 = vld [vmem:[#allocation2] ss:$0 sm:$0xff] }
  0x34   : > { %v379_v5 = vpack.c.b16 %v378_v4, %v378_v4  ;;  %v471_v9 = vunpack.c.l.b16 %v467_v8  ;;  %354 = vmatpush.bf16.msra.mxu1 %v332_v14  ;;  %341 = vmatpush.bf16.msra.mxu0 %v329_v15  ;;  %v315_v16 = vld [vmem:[#allocation6] sm:$0xf]  ;;  %vm271_vm2 = vcmp.lt.s32.totalorder %v270_v23, 127  ;;  %vm287_vm3 = vcmp.lt.s32.totalorder %v270_v23, 112  ;;  %s623_s18 = sshll.u32 %s985_s13, 6  ;;  %s797_s14 = scalar_lea.hbm %s1081_s5, 128 }
  0x35   : > { %v426_v10 = vpack.c.b16 %v425_v7, %v425_v7  ;;  %v263_v17 = vld [vmem:[%s1079_s3] sm:$0xff]  ;;  %vm303_vm4 = vcmp.lt.s32.totalorder %v270_v23, 111  ;;  %vm382_vm5 = vcmask 130048   ;;  %vm475_vm6 = vcmask 261120   ;;  %s1032_s24 = scalar_lea.vmem [#allocation8], %s623_s18 }
  0x36   : > { %380 = vrot.lane.b32.xlu1 %v379_v5, %s852_s25  ;;  %v472_v11 = vpack.c.b16 %v471_v9, %v471_v9  ;;  %v624_v24 = vld [vmem:[%s1078_s2 + $0x1] ss:$4 sm:$0x3]  ;;  %v625_v28 = vld [vmem:[%s1078_s2 + $0x2] ss:$4 sm:$0x3] }
  0x37   : > { %627 = vmatmul.msk.bf16.vlgmr.msra.gmra.mxu0 %vm323_vm1, %v315_v16  ;;  %628 = vmatmul.msk.bf16.vlgmr.msra.gmra.mxu1 %vm323_vm1, %v315_v16  ;;  %v277_v26 = vperm.slane %v624_v24, 0  ;;  %v278_v27 = vperm.slane %v624_v24, 1  ;;  %v293_v34 = vperm.slane %v625_v28, 0  ;;  %v294_v35 = vperm.slane %v625_v28, 1 }
  0x38   : > { %v626_v37 = vld [vmem:[%s1078_s2 + $0x3] ss:$4 sm:$0x3] }
  0x39   : > { %267 = vrot.lane.b32.xlu0 %v999_v3, %s850_s30  ;;  %299 = vrot.lane.b32.xlu2 %v997_v1, %s853_s27  ;;  %v309_v43 = vperm.slane %v626_v37, 0  ;;  %v310_v46 = vperm.slane %v626_v37, 1  ;;  %s647_s30 = sshll.u32 %s913_s4, 6  ;;  %s515_s4 = scalar_lea.sflag [#allocation5], %s985_s13 }
  0x3e   : > { %283 = vrot.lane.b32.xlu1 %v997_v1, %s851_s19 }
  0x41   : > { %301 = vrot.lane.b32.xlu0 %v999_v3, %s853_s27  ;;  %427 = vrot.lane.b32.xlu2 %v426_v10, %s854_s28  ;;  %s526_s27 = scalar_lea.hbm %s1081_s5, %s647_s30  ;;  %s527_s28 = sshll.u32 %s1032_s24, 4  ;;  %s528_s28 = int_to_ptr.vmem [resolvable:$true] %s527_s28 }
  0x46   : > { %473 = vrot.lane.b32.xlu1 %v472_v11, %s855_s29  ;;  %s529_s29 = sshll.u32 %s526_s27, 4  ;;  %s530_s29 = int_to_ptr.hbm [resolvable:$true] %s529_s29 }
  0x47   : > { %s791_s6 = sshra.s32 %s530_s29, 4  ;;  %s792_s6 = int_to_ptr.hbm [resolvable:$true] %s791_s6 }
  0x48   : > { %s793_s7 = scalar_lea.hbm %s792_s6, 64  ;;  %p798_p9 = scmp.lt.s32.totalorder %s792_s6, %s1081_s5 }
  0x49   : > { %320 = vperm.xlu0 %714, %v263_v17   ;;  %p794_p1 = scmp.ne.s32.totalorder %s792_s6, %s793_s7  ;;  %p799_p10 = scmp.lt.s32.totalorder %s797_s14, %s793_s7 }
  0x4b   : > { %p795_p4 = pnand %p794_p1, %p958_p3  ;;  %p800_p2 = por %p799_p10, %p798_p9 }
  0x4d   : > { %p796_p8 = pneg %p795_p4 }
  0x4e   : > { %365 = vperm.xlu1 %715, %v716_v22  }
  0x4f   : > { %p801_p11 = pnand %p800_p2, %p796_p8 }
  0x8b   : > { %v286_v21 = vpop.permute.xlu2 %285 }
  0x93   : > { %v300_v36 = vpop.permute.xlu2 %299 }
  0x9b   : > { %v428_v54 = vpop.permute.xlu2 %427 }
  0xa3   : > { %v266_v20 = vpop.permute.xlu0 %265 }
  0xa8   : > { %v381_v25 = vpop.permute.xlu1 %380 }
  0xab   : > { %v268_v29 = vpop.permute.xlu0 %267 }
  0xac   : > { %v272_v30 = vsel %vm271_vm2, %v266_v20, %v268_v29  ;;  %v273_v31 = vsel %vm271_vm2, %v268_v29, %v266_v20 }
  0xad   : > { %v281_v32 = vmul.f32 %v277_v26, %v272_v30  ;;  %v282_v33 = vmul.f32 %v278_v27, %v273_v31 }
  0xaf   : > { %v375_v39 = vpack.c.bf16 %v997_v1, %v281_v32  ;;  %v376_v40 = vpack.c.bf16 %v999_v3, %v282_v33 }
  0xb0   : > { %v284_v38 = vpop.permute.xlu1 %283 }
  0xb1   : > { %v288_v41 = vsel %vm287_vm3, %v284_v38, %v286_v21  ;;  %v289_v42 = vsel %vm287_vm3, %v286_v21, %v284_v38  ;;  %393 = vmatpush.bf16.msra.mxu2 %v375_v39  ;;  %406 = vmatpush.bf16.msra.mxu3 %v376_v40 }
  0xb2   : > { %v297_v44 = vmul.f32 %v293_v34, %v288_v41  ;;  %v298_v45 = vmul.f32 %v294_v35, %v289_v42 }
  0xb3   : > { %v302_v47 = vpop.permute.xlu0 %301 }
  0xb4   : > { %v422_v48 = vpack.c.bf16 %v997_v1, %v297_v44  ;;  %v423_v49 = vpack.c.bf16 %v999_v3, %v298_v45  ;;  %v304_v50 = vsel %vm303_vm4, %v300_v36, %v302_v47  ;;  %v305_v51 = vsel %vm303_vm4, %v302_v47, %v300_v36  ;;  %629 = vmatmul.msk.bf16.vlgmr.msra.gmra.mxu2 %vm382_vm5, %v381_v25  ;;  %v343_v58 = vpop.f32.mrf.mxu0  ;;  %v356_v59 = vpop.f32.mrf.mxu1 }
  0xb5   : > { %485 = vmatpush.bf16.msrb.mxu2 %v375_v39  ;;  %498 = vmatpush.bf16.msrb.mxu3 %v376_v40  ;;  %v313_v52 = vmul.f32 %v309_v43, %v304_v50  ;;  %v314_v53 = vmul.f32 %v310_v46, %v305_v51 }
  0xb6   : > { %630 = vmatmul.msk.bf16.vlgmr.msra.gmra.mxu3 %vm382_vm5, %v381_v25  ;;  %439 = vmatpush.bf16.msrb.mxu0 %v422_v48 }
  0xb7   : > { %452 = vmatpush.bf16.msrb.mxu1 %v423_v49  ;;  %v468_v55 = vpack.c.bf16 %v297_v44, %v313_v52  ;;  %v469_v56 = vpack.c.bf16 %v298_v45, %v314_v53 }
  0xb8   : > { %v474_v57 = vpop.permute.xlu1 %473 }
  0xb9   : > { %633 = vmatmul.msk.bf16.vlgmr.msrb.gmra.mxu0 %vm382_vm5, %v428_v54  ;;  %486 = vmatpush.bf16.msrb.mxu2 %v468_v55 }
  0xba   : > { %634 = vmatmul.msk.bf16.vlgmr.msrb.gmra.mxu1 %vm382_vm5, %v428_v54  ;;  %499 = vmatpush.bf16.msrb.mxu3 %v469_v56 }
  0xbb   : > { %v321_v60 = vpop.permute.xlu0 %320 }
  0xbc   : > { %v344_v61 = vadd.f32 %v343_v58, %v321_v60  ;;  %v357_v62 = vadd.f32 %v356_v59, %v321_v60  ;;  %v358_v63 = vpop.f32.mrf.mxu1  ;;  %v345_v3 = vpop.f32.mrf.mxu0 }
  0xbe   : > { %vm360_vm7 = vcmp.ge.f32.partialorder %v344_v61, 0.0  ;;  %vm361_vm8 = vcmp.ge.f32.partialorder %v357_v62, 0.0 }
  0xc0   : > { %v366_v0 = vpop.permute.xlu1 %365 }
  0xc1   : > { %v368_v1 = vmul.f32 %v366_v0, %v344_v61  ;;  %v369_v2 = vmul.f32 %v366_v0, %v357_v62 }
  0xc3   : > { %v370_v4 = vsel %vm360_vm7, %v344_v61, %v368_v1  ;;  %v371_v5 = vsel %vm361_vm8, %v357_v62, %v369_v2 }
  0xc4   : > { %637 = vmatmul.msk.bf16.vlgmr.msrb.gmra.mxu2 %vm475_vm6, %v474_v57  ;;  %372 = vst [vmem:[%s1032_s24] sm:$0xff] %v370_v4 }
  0xc5   : > { %373 = vst [vmem:[%s1032_s24 + $0x8] sm:$0xff] %v371_v5 }
  0xc6   : > { %638 = vmatmul.msk.bf16.vlgmr.msrb.gmra.mxu3 %vm475_vm6, %v474_v57 }
 0x136   : > { %v441_v6 = vpop.f32.mrf.mxu0 }
 0x137   : > { %v454_v7 = vpop.f32.mrf.mxu1  ;;  %v442_v8 = vadd.f32 %v441_v6, %v321_v60  ;;  %v395_v10 = vpop.f32.mrf.mxu2 }
 0x138   : > { %v455_v9 = vadd.f32 %v454_v7, %v321_v60  ;;  %v396_v12 = vadd.f32 %v395_v10, %v321_v60 }
 0x139   : > { %v408_v11 = vpop.f32.mrf.mxu3  ;;  %vm458_vm9 = vcmp.ge.f32.partialorder %v442_v8, 0.0  ;;  %v460_v14 = vmul.f32 %v442_v8, %v366_v0 }
 0x13a   : > { %v409_v13 = vadd.f32 %v408_v11, %v321_v60  ;;  %vm459_vm10 = vcmp.ge.f32.partialorder %v455_v9, 0.0  ;;  %v461_v15 = vmul.f32 %v455_v9, %v366_v0  ;;  %vm412_vm11 = vcmp.ge.f32.partialorder %v396_v12, 0.0 }
 0x13b   : > { %v414_v16 = vmul.f32 %v396_v12, %v366_v0  ;;  %v462_v18 = vsel %vm458_vm9, %v442_v8, %v460_v14 }
 0x13c   : > { %vm413_vm12 = vcmp.ge.f32.partialorder %v409_v13, 0.0  ;;  %v415_v17 = vmul.f32 %v409_v13, %v366_v0  ;;  %635 = vst [vmem:[%s1032_s24 + $0x20] sm:$0xff] %v462_v18  ;;  %v463_v21 = vsel %vm459_vm10, %v455_v9, %v461_v15 }
 0x13d   : > { %v416_v19 = vsel %vm412_vm11, %v396_v12, %v414_v16  ;;  %636 = vst [vmem:[%s1032_s24 + $0x28] sm:$0xff] %v463_v21 }
 0x13e   : > { %v417_v20 = vsel %vm413_vm12, %v409_v13, %v415_v17  ;;  %631 = vst [vmem:[%s1032_s24 + $0x10] sm:$0xff] %v416_v19  ;;  %v443_v22 = vpop.f32.mrf.mxu0 }
 0x13f   : > { %v456_v23 = vpop.f32.mrf.mxu1  ;;  %632 = vst [vmem:[%s1032_s24 + $0x18] sm:$0xff] %v417_v20  ;;  %v397_v24 = vpop.f32.mrf.mxu2 }
 0x141   : > { %v410_v25 = vpop.f32.mrf.mxu3 }
 0x147   : > { %v488_v26 = vpop.f32.mrf.mxu2 }
 0x148   : > { %v489_v28 = vadd.f32 %v488_v26, %v321_v60 }
 0x149   : > { %v501_v27 = vpop.f32.mrf.mxu3 }
 0x14a   : > { %v502_v29 = vadd.f32 %v501_v27, %v321_v60  ;;  %vm505_vm13 = vcmp.ge.f32.partialorder %v489_v28, 0.0  ;;  %v507_v30 = vmul.f32 %v489_v28, %v366_v0 }
 0x14c   : > { %vm506_vm14 = vcmp.ge.f32.partialorder %v502_v29, 0.0  ;;  %v508_v31 = vmul.f32 %v502_v29, %v366_v0  ;;  %v509_v32 = vsel %vm505_vm13, %v489_v28, %v507_v30 }
 0x14d   : > { %639 = vst [vmem:[%s1032_s24 + $0x30] sm:$0xff] %v509_v32 }
 0x14e   : > { %v510_v33 = vsel %vm506_vm14, %v502_v29, %v508_v31 }
 0x14f   : > { %640 = vst [vmem:[%s1032_s24 + $0x38] sm:$0xff] %v510_v33  ;;  %v490_v34 = vpop.f32.mrf.mxu2 }
 0x151   : > { %v503_v35 = vpop.f32.mrf.mxu3 }
 0x152   : > { %804 = shalt.err (!%p801_p11)
}
 0x153   : > { %s857_s13 = smov 256   ;;  %s858_s17 = smov 16  }
 0x154   : > { %654 = dma.vmem_to_hbm [thread:$0]  (%p958_p3), %s528_s28, 1024, %s530_s29, %s515_s4, %s857_s13, %s857_s13, %s858_s17  }
 0x155 PF: > { %s544_s18 = sand.u32 1, %s835_s20   ;;  %p1087_p12 = scmp.ge.s32.totalorder %s847_s23, 2 }
 0x156   : > { %s545_s24 = scalar_lea.sflag [#allocation5], %s544_s18 }
 0x157   : > { %p665_p13 = pnand %p1087_p12, %p927_p6 }
 0x159   : > { %p666_p0 = pneg %p665_p13 }
 0x15b   : > { %830 = dma.done.wait (%p666_p0), %s545_s24, 1024  }
 0x15c   : > { %832 = vsyncadd (%p666_p0), %s545_s24, 4294966272  ;;  %p21_p5 = scmp.ge.s32.totalorder %s945_s8, 4   ;;  %s1088_s20 = smov %s839_s21 }
 0x15d   : > { %s1089_s21 = smov %s843_s22  ;;  %s1090_s22 = smov %s954_s11 }
 0x15e   : > { %s1091_s23 = smov %s945_s8  ;;  %23 = sbr.rel (!%p21_p5) target bundleno = 9 (0x9), region = 95 }
 0x163   :  { %551 = vsyncpa [#allocation4], 1 }
 0x164   :  { %553 = vsyncpa [#allocation4 + $0x1], 1 }
 0x165   :  { %554 = vsyncpa [#allocation7], 1 }
 0x166   :  { %555 = vsyncpa [#allocation5], 1 }
 0x167   :  { %557 = vsyncpa [#allocation5 + $0x1], 1 }

</bundles_post_ra>
